<compile_context>
chip_gen: v6e
topology: v6e:2x2x1
jax: 0.10.0
libtpu: 0.0.40
codegen_flags: <defaults>
</compile_context>

<pallas_src>
import jax
import jax.numpy as jnp
from jax import lax
from jax.experimental import pallas as pl
from jax.experimental.pallas import tpu as pltpu


def _round_up(x, m):
    return ((x + m - 1) // m) * m


def _make_kernel(TB, L, V, E, F, filter_sizes, n_classes_list, W):
    """Builds the kernel body; all shapes are closed over statically.

    TB: sequences per grid block, L: seq length, V: vocab, E: embed dim,
    F: filters per conv, W: lane-dense working width (multiple of 128).
    """
    KMAX = max(filter_sizes)
    FEAT = F * len(filter_sizes)
    BL = TB * L
    assert L >= KMAX, "sequence length must be >= the largest filter size"
    assert FEAT <= W and sum(n_classes_list) <= W

    def kernel(ids_ref, table_ref, w_ref, bias_ref, out_ref):
        # ---- embedding lookup fused in-kernel: one-hot @ table on the MXU.
        # TODO(synk): for large vocabularies replace the one-hot matmul with a
        # row-gather DMA (pl.Element index_map or manual make_async_copy).
        ids = ids_ref[...]                                           # (BL,1) i32
        hot = lax.broadcasted_iota(jnp.int32, (BL, V), 1) == ids     # (BL,V)
        onehot = jnp.where(hot, 1.0, 0.0).astype(jnp.bfloat16)
        emb = jnp.dot(onehot, table_ref[...],
                      preferred_element_type=jnp.float32)            # (BL,E) f32

        # ---- conv taps as shifted-row-LHS MXU matmuls (no lane slices).
        # acc[t, i*F+f] = sum_j emb[t+j] . W_i[f,:,j]; taps j >= K_i are zero
        # columns in the packed weights.  Row wrap-around only touches
        # positions that are masked before the max-pool.
        acc = None
        for j in range(KMAX):
            # jnp.roll (static shift) lowers to a sublane slice+concat of the
            # narrow (BL, E) LHS; swap in pltpu.roll(emb, BL - j, axis=0) to
            # push this onto the XLU if it ever shows in profiles.
            emb_j = emb if j == 0 else jnp.roll(emb, -j, axis=0)
            w_j = w_ref[j * E:(j + 1) * E, :]                        # (E,W) bf16
            y_j = jnp.dot(emb_j.astype(jnp.bfloat16), w_j,
                          preferred_element_type=jnp.float32)        # (BL,W) f32
            acc = y_j if acc is None else acc + y_j

        # ---- bias + ReLU + validity mask + per-sequence global max-pool.
        conv_bias = bias_ref[0:1, :].reshape(1, 1, W)                # f32
        act = jnp.maximum(acc.reshape(TB, L, W) + conv_bias, 0.0)
        pos = lax.broadcasted_iota(jnp.int32, (TB, L, W), 1)
        lane = lax.broadcasted_iota(jnp.int32, (TB, L, W), 2)
        thr = jnp.full_like(pos, -1)
        for i, K in enumerate(filter_sizes):
            thr = jnp.where((lane >= i * F) & (lane < (i + 1) * F), L - K, thr)
        # ReLU output is >= 0, so zeroing invalid rows keeps the max exact.
        act = jnp.where(pos <= thr, act, 0.0)
        feat = jnp.max(act, axis=1)                                  # (TB,W) f32
        # nn.Dropout is identity at inference time.
        # TODO(synk): training-mode stochastic dropout not implemented.

        # ---- merged task heads: one MXU matmul, lane-dense 128-wide logits.
        fcw = w_ref[KMAX * E:KMAX * E + W, :]                        # (W,W) bf16
        fc_bias = bias_ref[1:2, :]                                   # (1,W) f32
        logits = jnp.dot(feat.astype(jnp.bfloat16), fcw,
                         preferred_element_type=jnp.float32) + fc_bias

        # ---- per-head log-softmax with full-width lane masks (no sub-128
        # lane slices); padding lanes are 0 and sliced off in the wrapper.
        hl = lax.broadcasted_iota(jnp.int32, (TB, W), 1)
        out = jnp.zeros((TB, W), jnp.float32)
        c0 = 0
        for C in n_classes_list:
            head = (hl >= c0) & (hl < c0 + C)
            lg = jnp.where(head, logits, -1e30)
            m = jnp.max(lg, axis=1, keepdims=True)
            s = jnp.sum(jnp.where(head, jnp.exp(lg - m), 0.0),
                        axis=1, keepdims=True)
            out = jnp.where(head, lg - (m + jnp.log(s)), out)
            c0 += C
        out_ref[...] = out

    return kernel


def pack_mtcnn_params(conv_weights, conv_biases, fc_weights, fc_biases):
    """Pack PyTorch-layout params into (bf16 weights, f32 biases) buffers.

    conv_weights[i]: (F, E, K_i) nn.Conv1d layout, conv_biases[i]: (F,)
    fc_weights[t]:   (C_t, 3F)   nn.Linear layout,  fc_biases[t]:  (C_t,)

    w_packed (bf16), shape (KMAX*E + W, W) with W = 128-aligned lane width:
      rows [j*E, (j+1)*E): tap-j weights, conv i at lanes [i*F, (i+1)*F),
                           zeros for j >= K_i and elsewhere.
      rows [KMAX*E, KMAX*E+W): FC weights (feature lane -> class lane),
                           zeros outside [0,3F) x [0, C_total).
    bias_packed (f32), shape (8, W): row 0 conv bias, row 1 fc bias (lane
    layout matching the above), remaining rows zero padding.
    """
    F, E, _ = conv_weights[0].shape
    filter_sizes = [int(w.shape[2]) for w in conv_weights]
    KMAX = max(filter_sizes)
    FEAT = F * len(conv_weights)
    n_classes = [int(w.shape[0]) for w in fc_weights]
    C_TOT = sum(n_classes)
    W = max(128, _round_up(FEAT, 128), _round_up(C_TOT, 128))

    taps = []
    for j in range(KMAX):
        blk = jnp.zeros((E, W), jnp.float32)
        for i, cw in enumerate(conv_weights):
            if j < cw.shape[2]:
                blk = blk.at[:, i * F:(i + 1) * F].set(cw[:, :, j].T)  # (E,F)
        taps.append(blk)

    fcw = jnp.zeros((W, W), jnp.float32)
    c0 = 0
    for w in fc_weights:
        C = w.shape[0]
        fcw = fcw.at[0:FEAT, c0:c0 + C].set(w.T)
        c0 += C

    w_packed = jnp.concatenate(taps + [fcw], axis=0).astype(jnp.bfloat16)

    conv_b = jnp.zeros((W,), jnp.float32)
    for i, b in enumerate(conv_biases):
        conv_b = conv_b.at[i * F:(i + 1) * F].set(b)
    fc_b = jnp.zeros((W,), jnp.float32)
    c0 = 0
    for b in fc_biases:
        fc_b = fc_b.at[c0:c0 + b.shape[0]].set(b)
        c0 += b.shape[0]
    bias_packed = jnp.zeros((8, W), jnp.float32).at[0].set(conv_b).at[1].set(fc_b)
    return w_packed, bias_packed


def mtcnn_forward(token_ids, emb_matrix, w_packed, bias_packed, config):
    """token_ids: (B, L) int32.  Returns a dict of per-task log-probs."""
    B, L = token_ids.shape
    V, E = emb_matrix.shape
    F = config["n_filters"]
    filter_sizes = tuple(config["filter_sizes"])
    tasks = tuple(config["tasks"])
    n_classes_list = [config["n_classes"][t] for t in tasks]
    W = int(w_packed.shape[1])
    assert L >= max(filter_sizes), "L must be >= the largest filter size"
    # L % 8 == 0 keeps the in-kernel (BL, W) -> (TB, L, W) reshape a free
    # sublane split; other lengths still work (extra relayout copy).

    # Batch tiling: whole sequences per block so the batch axis pipelines and
    # megacore-shards; toy batches (B < 8) run as a single block.
    if B % 8 == 0:
        TB = 8
        while TB * 2 <= B and B % (TB * 2) == 0 and (TB * 2) * L <= 2048:
            TB *= 2
    else:
        TB = B
    grid = (B // TB,)

    ids = token_ids.reshape(B * L, 1).astype(jnp.int32)
    table = emb_matrix.astype(jnp.bfloat16)     # bf16 MXU operand (tiny cast)

    kernel = _make_kernel(TB, L, V, E, F, filter_sizes, n_classes_list, W)
    out = pl.pallas_call(
        kernel,
        out_shape=jax.ShapeDtypeStruct((B, W), jnp.float32),
        grid=grid,
        in_specs=[
            pl.BlockSpec((TB * L, 1), lambda b: (b, 0)),              # ids
            pl.BlockSpec((V, E), lambda b: (0, 0)),                   # table
            pl.BlockSpec(tuple(w_packed.shape), lambda b: (0, 0)),    # weights
            pl.BlockSpec(tuple(bias_packed.shape), lambda b: (0, 0)),  # biases
        ],
        out_specs=pl.BlockSpec((TB, W), lambda b: (b, 0)),
        compiler_params=pltpu.CompilerParams(
            dimension_semantics=("parallel",)),
    )(ids, table, w_packed, bias_packed)

    result = {}
    c0 = 0
    for task, C in zip(tasks, n_classes_list):
        result[task] = out[:, c0:c0 + C]
        c0 += C
    return result


def reference_forward(token_ids, emb_matrix, conv_weights, conv_biases,
                      fc_weights, fc_biases, tasks):
    """Pure-JAX f32 reference matching the PyTorch forward (eval mode)."""
    emb = emb_matrix[token_ids].astype(jnp.float32)                 # (B, L, E)
    B, L, E = emb.shape
    feats = []
    for w, b in zip(conv_weights, conv_biases):
        F, _, K = w.shape
        Lout = L - K + 1
        acc = jnp.zeros((B, Lout, F), jnp.float32)
        for j in range(K):
            acc = acc + jnp.einsum('ble,fe->blf', emb[:, j:j + Lout, :], w[:, :, j])
        acc = jnp.maximum(acc + b[None, None, :], 0.0)
        feats.append(jnp.max(acc, axis=1))
    feat = jnp.concatenate(feats, axis=1)
    out = {}
    for task, fcw, fcb in zip(tasks, fc_weights, fc_biases):
        logits = feat @ fcw.T + fcb
        out[task] = logits - jax.scipy.special.logsumexp(logits, axis=1,
                                                         keepdims=True)
    return out


if __name__ == "__main__":
    # Small, deterministic configuration.
    VOCAB, EMB_DIM = 64, 32
    N_FILTERS = 16
    FILTER_SIZES = (3, 4, 5)
    TASKS = ("task_a", "task_b")
    N_CLASSES = {"task_a": 4, "task_b": 3}
    B, L = 2, 16

    key = jax.random.PRNGKey(0)
    keys = jax.random.split(key, 12)

    emb_matrix = jax.random.normal(keys[0], (VOCAB, EMB_DIM), jnp.float32) * 0.1
    emb_matrix = emb_matrix.at[0].set(0.0)              # padding row

    conv_weights, conv_biases = [], []
    for i, K in enumerate(FILTER_SIZES):
        conv_weights.append(
            jax.random.normal(keys[1 + 2 * i], (N_FILTERS, EMB_DIM, K),
                              jnp.float32) * 0.1)       # PyTorch Conv1d layout
        conv_biases.append(
            jax.random.normal(keys[2 + 2 * i], (N_FILTERS,), jnp.float32) * 0.1)

    feat_dim = N_FILTERS * len(FILTER_SIZES)
    fc_weights, fc_biases = [], []
    for i, task in enumerate(TASKS):
        C = N_CLASSES[task]
        fc_weights.append(
            jax.random.normal(keys[7 + 2 * i], (C, feat_dim), jnp.float32) * 0.1)
        fc_biases.append(
            jax.random.normal(keys[8 + 2 * i], (C,), jnp.float32) * 0.1)

    token_ids = jax.random.randint(keys[11], (B, L), 0, VOCAB, jnp.int32)

    w_packed, bias_packed = pack_mtcnn_params(conv_weights, conv_biases,
                                              fc_weights, fc_biases)
    config = {"n_filters": N_FILTERS, "filter_sizes": FILTER_SIZES,
              "tasks": TASKS, "n_classes": N_CLASSES}

    out = mtcnn_forward(token_ids, emb_matrix, w_packed, bias_packed, config)
    out = jax.tree_util.tree_map(jax.block_until_ready, out)

    ref = reference_forward(token_ids, emb_matrix, conv_weights, conv_biases,
                            fc_weights, fc_biases, TASKS)
    for task in TASKS:
        assert out[task].shape == (B, N_CLASSES[task])
        # bf16 matmul operands (f32 accumulation) -> looser tolerance vs f32 ref
        assert jnp.allclose(out[task], ref[task], atol=2e-2, rtol=2e-2), task

    print("KERNEL_OK")
</pallas_src>

<mosaic_0001>
module attributes {stable_mosaic.version = 11 : i64} {
  func.func @kernel(%arg0: i32, %arg1: memref<32x1xi32, #tpu.memory_space<vmem>>, %arg2: memref<64x32xbf16, #tpu.memory_space<vmem>>, %arg3: memref<288x128xbf16, #tpu.memory_space<vmem>>, %arg4: memref<8x128xf32, #tpu.memory_space<vmem>>, %arg5: memref<2x128xf32, #tpu.memory_space<vmem>>) attributes {dimension_semantics = [#tpu.dimension_semantics<parallel>], iteration_bounds = array<i64: 1>, scalar_prefetch = 0 : i64, scratch_operands = 0 : i64, tpu.core_type = #tpu.core_type<tc>, window_params = [{transform_indices = @transform_0, window_bounds = array<i64: 32, 1>}, {pipeline_mode = #tpu.pipeline_mode<synchronous>, transform_indices = @transform_1, window_bounds = array<i64: 64, 32>}, {pipeline_mode = #tpu.pipeline_mode<synchronous>, transform_indices = @transform_2, window_bounds = array<i64: 288, 128>}, {pipeline_mode = #tpu.pipeline_mode<synchronous>, transform_indices = @transform_3, window_bounds = array<i64: 8, 128>}, {transform_indices = @transform_4, window_bounds = array<i64: 2, 128>}]} {
    %c0 = arith.constant 0 : index
    %c0_0 = arith.constant 0 : index
    %0 = vector.load %arg1[%c0, %c0_0] : memref<32x1xi32, #tpu.memory_space<vmem>>, vector<32x1xi32>
    %1 = tpu.iota {dimensions = array<i32: 1>} : vector<32x64xi32>
    %2 = vector.broadcast %0 : vector<32x1xi32> to vector<32x64xi32>
    %3 = arith.cmpi eq, %1, %2 : vector<32x64xi32>
    %cst = arith.constant 1.000000e+00 : f32
    %cst_1 = arith.constant 0.000000e+00 : f32
    %4 = vector.broadcast %cst : f32 to vector<32x64xf32>
    %5 = vector.broadcast %cst_1 : f32 to vector<32x64xf32>
    %6 = arith.select %3, %4, %5 : vector<32x64xi1>, vector<32x64xf32>
    %7 = arith.truncf %6 : vector<32x64xf32> to vector<32x64xbf16>
    %c0_2 = arith.constant 0 : index
    %c0_3 = arith.constant 0 : index
    %8 = vector.load %arg2[%c0_2, %c0_3] : memref<64x32xbf16, #tpu.memory_space<vmem>>, vector<64x32xbf16>
    %cst_4 = arith.constant dense<0.000000e+00> : vector<32x32xf32>
    %9 = tpu.matmul %7, %8, %cst_4 {dimension_numbers = #tpu.dot_dimension_numbers<[1], [0], [0], [1], [0, 0, 1, 1], [], []>} : vector<32x64xbf16>, vector<64x32xbf16>, vector<32x32xf32> -> vector<32x32xf32>
    %c0_5 = arith.constant 0 : index
    %c0_6 = arith.constant 0 : index
    %10 = vector.load %arg3[%c0_5, %c0_6] : memref<288x128xbf16, #tpu.memory_space<vmem>>, vector<32x128xbf16>
    %11 = arith.truncf %9 : vector<32x32xf32> to vector<32x32xbf16>
    %cst_7 = arith.constant dense<0.000000e+00> : vector<32x128xf32>
    %12 = tpu.matmul %11, %10, %cst_7 {dimension_numbers = #tpu.dot_dimension_numbers<[1], [0], [0], [1], [0, 0, 1, 1], [], []>} : vector<32x32xbf16>, vector<32x128xbf16>, vector<32x128xf32> -> vector<32x128xf32>
    %13 = vector.extract_strided_slice %9 {offsets = [1, 0], sizes = [31, 32], strides = [1, 1]} : vector<32x32xf32> to vector<31x32xf32>
    %14 = vector.extract_strided_slice %9 {offsets = [0, 0], sizes = [1, 32], strides = [1, 1]} : vector<32x32xf32> to vector<1x32xf32>
    %15 = tpu.concatenate %13, %14 in 0 : vector<31x32xf32>, vector<1x32xf32> -> vector<32x32xf32>
    %c32 = arith.constant 32 : index
    %c0_8 = arith.constant 0 : index
    %16 = vector.load %arg3[%c32, %c0_8] : memref<288x128xbf16, #tpu.memory_space<vmem>>, vector<32x128xbf16>
    %17 = arith.truncf %15 : vector<32x32xf32> to vector<32x32xbf16>
    %cst_9 = arith.constant dense<0.000000e+00> : vector<32x128xf32>
    %18 = tpu.matmul %17, %16, %cst_9 {dimension_numbers = #tpu.dot_dimension_numbers<[1], [0], [0], [1], [0, 0, 1, 1], [], []>} : vector<32x32xbf16>, vector<32x128xbf16>, vector<32x128xf32> -> vector<32x128xf32>
    %19 = arith.addf %12, %18 : vector<32x128xf32>
    %20 = vector.extract_strided_slice %9 {offsets = [2, 0], sizes = [30, 32], strides = [1, 1]} : vector<32x32xf32> to vector<30x32xf32>
    %21 = vector.extract_strided_slice %9 {offsets = [0, 0], sizes = [2, 32], strides = [1, 1]} : vector<32x32xf32> to vector<2x32xf32>
    %22 = tpu.concatenate %20, %21 in 0 : vector<30x32xf32>, vector<2x32xf32> -> vector<32x32xf32>
    %c64 = arith.constant 64 : index
    %c0_10 = arith.constant 0 : index
    %23 = vector.load %arg3[%c64, %c0_10] : memref<288x128xbf16, #tpu.memory_space<vmem>>, vector<32x128xbf16>
    %24 = arith.truncf %22 : vector<32x32xf32> to vector<32x32xbf16>
    %cst_11 = arith.constant dense<0.000000e+00> : vector<32x128xf32>
    %25 = tpu.matmul %24, %23, %cst_11 {dimension_numbers = #tpu.dot_dimension_numbers<[1], [0], [0], [1], [0, 0, 1, 1], [], []>} : vector<32x32xbf16>, vector<32x128xbf16>, vector<32x128xf32> -> vector<32x128xf32>
    %26 = arith.addf %19, %25 : vector<32x128xf32>
    %27 = vector.extract_strided_slice %9 {offsets = [3, 0], sizes = [29, 32], strides = [1, 1]} : vector<32x32xf32> to vector<29x32xf32>
    %28 = vector.extract_strided_slice %9 {offsets = [0, 0], sizes = [3, 32], strides = [1, 1]} : vector<32x32xf32> to vector<3x32xf32>
    %29 = tpu.concatenate %27, %28 in 0 : vector<29x32xf32>, vector<3x32xf32> -> vector<32x32xf32>
    %c96 = arith.constant 96 : index
    %c0_12 = arith.constant 0 : index
    %30 = vector.load %arg3[%c96, %c0_12] : memref<288x128xbf16, #tpu.memory_space<vmem>>, vector<32x128xbf16>
    %31 = arith.truncf %29 : vector<32x32xf32> to vector<32x32xbf16>
    %cst_13 = arith.constant dense<0.000000e+00> : vector<32x128xf32>
    %32 = tpu.matmul %31, %30, %cst_13 {dimension_numbers = #tpu.dot_dimension_numbers<[1], [0], [0], [1], [0, 0, 1, 1], [], []>} : vector<32x32xbf16>, vector<32x128xbf16>, vector<32x128xf32> -> vector<32x128xf32>
    %33 = arith.addf %26, %32 : vector<32x128xf32>
    %34 = vector.extract_strided_slice %9 {offsets = [4, 0], sizes = [28, 32], strides = [1, 1]} : vector<32x32xf32> to vector<28x32xf32>
    %35 = vector.extract_strided_slice %9 {offsets = [0, 0], sizes = [4, 32], strides = [1, 1]} : vector<32x32xf32> to vector<4x32xf32>
    %36 = tpu.concatenate %34, %35 in 0 : vector<28x32xf32>, vector<4x32xf32> -> vector<32x32xf32>
    %c128 = arith.constant 128 : index
    %c0_14 = arith.constant 0 : index
    %37 = vector.load %arg3[%c128, %c0_14] : memref<288x128xbf16, #tpu.memory_space<vmem>>, vector<32x128xbf16>
    %38 = arith.truncf %36 : vector<32x32xf32> to vector<32x32xbf16>
    %cst_15 = arith.constant dense<0.000000e+00> : vector<32x128xf32>
    %39 = tpu.matmul %38, %37, %cst_15 {dimension_numbers = #tpu.dot_dimension_numbers<[1], [0], [0], [1], [0, 0, 1, 1], [], []>} : vector<32x32xbf16>, vector<32x128xbf16>, vector<32x128xf32> -> vector<32x128xf32>
    %40 = arith.addf %33, %39 : vector<32x128xf32>
    %c0_16 = arith.constant 0 : index
    %c0_17 = arith.constant 0 : index
    %41 = vector.load %arg4[%c0_16, %c0_17] : memref<8x128xf32, #tpu.memory_space<vmem>>, vector<1x128xf32>
    %42 = vector.shape_cast %41 : vector<1x128xf32> to vector<1x1x128xf32>
    %43 = vector.shape_cast %40 : vector<32x128xf32> to vector<2x16x128xf32>
    %44 = vector.broadcast %42 : vector<1x1x128xf32> to vector<2x16x128xf32>
    %45 = arith.addf %43, %44 : vector<2x16x128xf32>
    %cst_18 = arith.constant 0.000000e+00 : f32
    %46 = vector.broadcast %cst_18 : f32 to vector<2x16x128xf32>
    %47 = arith.maximumf %45, %46 : vector<2x16x128xf32>
    %48 = tpu.iota {dimensions = array<i32: 1>} : vector<2x16x128xi32>
    %49 = tpu.iota {dimensions = array<i32: 2>} : vector<2x16x128xi32>
    %c-1_i32 = arith.constant -1 : i32
    %50 = vector.broadcast %c-1_i32 : i32 to vector<2x16x128xi32>
    %c0_i32 = arith.constant 0 : i32
    %51 = vector.broadcast %c0_i32 : i32 to vector<2x16x128xi32>
    %52 = arith.cmpi sge, %49, %51 : vector<2x16x128xi32>
    %c16_i32 = arith.constant 16 : i32
    %53 = vector.broadcast %c16_i32 : i32 to vector<2x16x128xi32>
    %54 = arith.cmpi slt, %49, %53 : vector<2x16x128xi32>
    %55 = arith.andi %52, %54 : vector<2x16x128xi1>
    %c13_i32 = arith.constant 13 : i32
    %56 = vector.broadcast %c13_i32 : i32 to vector<2x16x128xi32>
    %57 = arith.select %55, %56, %50 : vector<2x16x128xi1>, vector<2x16x128xi32>
    %c16_i32_19 = arith.constant 16 : i32
    %58 = vector.broadcast %c16_i32_19 : i32 to vector<2x16x128xi32>
    %59 = arith.cmpi sge, %49, %58 : vector<2x16x128xi32>
    %c32_i32 = arith.constant 32 : i32
    %60 = vector.broadcast %c32_i32 : i32 to vector<2x16x128xi32>
    %61 = arith.cmpi slt, %49, %60 : vector<2x16x128xi32>
    %62 = arith.andi %59, %61 : vector<2x16x128xi1>
    %c12_i32 = arith.constant 12 : i32
    %63 = vector.broadcast %c12_i32 : i32 to vector<2x16x128xi32>
    %64 = arith.select %62, %63, %57 : vector<2x16x128xi1>, vector<2x16x128xi32>
    %c32_i32_20 = arith.constant 32 : i32
    %65 = vector.broadcast %c32_i32_20 : i32 to vector<2x16x128xi32>
    %66 = arith.cmpi sge, %49, %65 : vector<2x16x128xi32>
    %c48_i32 = arith.constant 48 : i32
    %67 = vector.broadcast %c48_i32 : i32 to vector<2x16x128xi32>
    %68 = arith.cmpi slt, %49, %67 : vector<2x16x128xi32>
    %69 = arith.andi %66, %68 : vector<2x16x128xi1>
    %c11_i32 = arith.constant 11 : i32
    %70 = vector.broadcast %c11_i32 : i32 to vector<2x16x128xi32>
    %71 = arith.select %69, %70, %64 : vector<2x16x128xi1>, vector<2x16x128xi32>
    %72 = arith.cmpi sle, %48, %71 : vector<2x16x128xi32>
    %cst_21 = arith.constant 0.000000e+00 : f32
    %73 = vector.broadcast %cst_21 : f32 to vector<2x16x128xf32>
    %74 = arith.select %72, %47, %73 : vector<2x16x128xi1>, vector<2x16x128xf32>
    %cst_22 = arith.constant dense<0xFF800000> : vector<2x128xf32>
    %75 = vector.multi_reduction <maximumf>, %74, %cst_22 [1] : vector<2x16x128xf32> to vector<2x128xf32>
    %c160 = arith.constant 160 : index
    %c0_23 = arith.constant 0 : index
    %76 = vector.load %arg3[%c160, %c0_23] : memref<288x128xbf16, #tpu.memory_space<vmem>>, vector<128x128xbf16>
    %c1 = arith.constant 1 : index
    %c0_24 = arith.constant 0 : index
    %77 = vector.load %arg4[%c1, %c0_24] : memref<8x128xf32, #tpu.memory_space<vmem>>, vector<1x128xf32>
    %78 = arith.truncf %75 : vector<2x128xf32> to vector<2x128xbf16>
    %cst_25 = arith.constant dense<0.000000e+00> : vector<2x128xf32>
    %79 = tpu.matmul %78, %76, %cst_25 {dimension_numbers = #tpu.dot_dimension_numbers<[1], [0], [0], [1], [0, 0, 1, 1], [], []>} : vector<2x128xbf16>, vector<128x128xbf16>, vector<2x128xf32> -> vector<2x128xf32>
    %80 = vector.broadcast %77 : vector<1x128xf32> to vector<2x128xf32>
    %81 = arith.addf %79, %80 : vector<2x128xf32>
    %82 = tpu.iota {dimensions = array<i32: 1>} : vector<2x128xi32>
    %cst_26 = arith.constant 0.000000e+00 : f32
    %83 = vector.broadcast %cst_26 : f32 to vector<2x128xf32>
    %c0_i32_27 = arith.constant 0 : i32
    %84 = vector.broadcast %c0_i32_27 : i32 to vector<2x128xi32>
    %85 = arith.cmpi sge, %82, %84 : vector<2x128xi32>
    %c4_i32 = arith.constant 4 : i32
    %86 = vector.broadcast %c4_i32 : i32 to vector<2x128xi32>
    %87 = arith.cmpi slt, %82, %86 : vector<2x128xi32>
    %88 = arith.andi %85, %87 : vector<2x128xi1>
    %cst_28 = arith.constant -1.000000e+30 : f32
    %89 = vector.broadcast %cst_28 : f32 to vector<2x128xf32>
    %90 = arith.select %88, %81, %89 : vector<2x128xi1>, vector<2x128xf32>
    %cst_29 = arith.constant dense<0xFF800000> : vector<2xf32>
    %91 = vector.multi_reduction <maximumf>, %90, %cst_29 [1] : vector<2x128xf32> to vector<2xf32>
    %92 = vector.shape_cast %91 : vector<2xf32> to vector<2x1xf32>
    %93 = vector.broadcast %92 : vector<2x1xf32> to vector<2x128xf32>
    %94 = arith.subf %90, %93 : vector<2x128xf32>
    %95 = math.exp %94 : vector<2x128xf32>
    %cst_30 = arith.constant 0.000000e+00 : f32
    %96 = vector.broadcast %cst_30 : f32 to vector<2x128xf32>
    %97 = arith.select %88, %95, %96 : vector<2x128xi1>, vector<2x128xf32>
    %cst_31 = arith.constant dense<0.000000e+00> : vector<2xf32>
    %98 = vector.multi_reduction <add>, %97, %cst_31 [1] : vector<2x128xf32> to vector<2xf32>
    %99 = vector.shape_cast %98 : vector<2xf32> to vector<2x1xf32>
    %100 = math.log %99 : vector<2x1xf32>
    %101 = arith.addf %92, %100 : vector<2x1xf32>
    %102 = vector.broadcast %101 : vector<2x1xf32> to vector<2x128xf32>
    %103 = arith.subf %90, %102 : vector<2x128xf32>
    %104 = arith.select %88, %103, %83 : vector<2x128xi1>, vector<2x128xf32>
    %c4_i32_32 = arith.constant 4 : i32
    %105 = vector.broadcast %c4_i32_32 : i32 to vector<2x128xi32>
    %106 = arith.cmpi sge, %82, %105 : vector<2x128xi32>
    %c7_i32 = arith.constant 7 : i32
    %107 = vector.broadcast %c7_i32 : i32 to vector<2x128xi32>
    %108 = arith.cmpi slt, %82, %107 : vector<2x128xi32>
    %109 = arith.andi %106, %108 : vector<2x128xi1>
    %cst_33 = arith.constant -1.000000e+30 : f32
    %110 = vector.broadcast %cst_33 : f32 to vector<2x128xf32>
    %111 = arith.select %109, %81, %110 : vector<2x128xi1>, vector<2x128xf32>
    %cst_34 = arith.constant dense<0xFF800000> : vector<2xf32>
    %112 = vector.multi_reduction <maximumf>, %111, %cst_34 [1] : vector<2x128xf32> to vector<2xf32>
    %113 = vector.shape_cast %112 : vector<2xf32> to vector<2x1xf32>
    %114 = vector.broadcast %113 : vector<2x1xf32> to vector<2x128xf32>
    %115 = arith.subf %111, %114 : vector<2x128xf32>
    %116 = math.exp %115 : vector<2x128xf32>
    %cst_35 = arith.constant 0.000000e+00 : f32
    %117 = vector.broadcast %cst_35 : f32 to vector<2x128xf32>
    %118 = arith.select %109, %116, %117 : vector<2x128xi1>, vector<2x128xf32>
    %cst_36 = arith.constant dense<0.000000e+00> : vector<2xf32>
    %119 = vector.multi_reduction <add>, %118, %cst_36 [1] : vector<2x128xf32> to vector<2xf32>
    %120 = vector.shape_cast %119 : vector<2xf32> to vector<2x1xf32>
    %121 = math.log %120 : vector<2x1xf32>
    %122 = arith.addf %113, %121 : vector<2x1xf32>
    %123 = vector.broadcast %122 : vector<2x1xf32> to vector<2x128xf32>
    %124 = arith.subf %111, %123 : vector<2x128xf32>
    %125 = arith.select %109, %124, %104 : vector<2x128xi1>, vector<2x128xf32>
    %c0_37 = arith.constant 0 : index
    %c0_38 = arith.constant 0 : index
    %126 = vector.load %arg5[%c0_37, %c0_38] : memref<2x128xf32, #tpu.memory_space<vmem>>, vector<2x128xf32>
    tpu.vector_store %arg5[%c0_37, %c0_38], %125 {strides = array<i32>} : memref<2x128xf32, #tpu.memory_space<vmem>>, vector<2x128xf32>,
    return
  }
  func.func @transform_0(%arg0: i32) -> (i32, i32) {
    %c0_i32 = arith.constant 0 : i32
    %c0_i32_0 = arith.constant 0 : i32
    return %arg0, %c0_i32 : i32, i32
  }
  func.func @transform_1(%arg0: i32) -> (i32, i32) {
    %c0_i32 = arith.constant 0 : i32
    %c0_i32_0 = arith.constant 0 : i32
    %c0_i32_1 = arith.constant 0 : i32
    return %c0_i32, %c0_i32_0 : i32, i32
  }
  func.func @transform_2(%arg0: i32) -> (i32, i32) {
    %c0_i32 = arith.constant 0 : i32
    %c0_i32_0 = arith.constant 0 : i32
    %c0_i32_1 = arith.constant 0 : i32
    return %c0_i32, %c0_i32_0 : i32, i32
  }
  func.func @transform_3(%arg0: i32) -> (i32, i32) {
    %c0_i32 = arith.constant 0 : i32
    %c0_i32_0 = arith.constant 0 : i32
    %c0_i32_1 = arith.constant 0 : i32
    return %c0_i32, %c0_i32_0 : i32, i32
  }
  func.func @transform_4(%arg0: i32) -> (i32, i32) {
    %c0_i32 = arith.constant 0 : i32
    %c0_i32_0 = arith.constant 0 : i32
    return %arg0, %c0_i32 : i32, i32
  }
}

</mosaic_0001>

<bundles_post_ra>
// kernel: tpu_custom_call.1
= control target key start
LH: loop header
LB: loop body
LE: loop exit
PB: predicated region body
PF: predicated region fallthrough
CT: control target
= control target key end

     0   :  { %9 = vsyncpa [#allocation3], 0  ;;  %s1206_s0 = inlined_call_operand.vmem [shape: s32[32,1], index: 0, kind: input, shape index: {}]   ;;  %s1207_s1 = inlined_call_operand.vmem [shape: bf16[64,32], index: 1, kind: input, shape index: {}]   ;;  %s1208_s2 = inlined_call_operand.hbm [shape: bf16[288,128], index: 2, kind: input, shape index: {}]   ;;  %s1209_s3 = inlined_call_operand.vmem [shape: f32[8,128], index: 3, kind: input, shape index: {}]   ;;  %s1210_s4 = inlined_call_operand.hbm [shape: f32[2,128], index: 4, kind: output, shape index: {}]  }
   0x1   :  { %10 = vsyncpa [#allocation4], 0  ;;  %s1035_s15 = smov [#allocation2]  }
   0x2   :  { %s20_s16 = sshll.u32 %s1035_s15, 4  ;;  %s21_s16 = int_to_ptr.vmem [resolvable:$true] %s20_s16 }
   0x3   :  { %s999_s17 = scalar_lea.vmem %s21_s16, 2304  ;;  %p1004_p1 = scmp.lt.s32.totalorder %s21_s16, %s21_s16 }
   0x4   :  { %p1000_p0 = scmp.ne.s32.totalorder %s21_s16, %s999_s17  ;;  %p1005_p2 = scmp.lt.s32.totalorder %s999_s17, %s999_s17 }
   0x6   :  { %p1006_p3 = por %p1005_p2, %p1004_p1 }
   0x8   :  { %p1007_p4 = pnand %p1006_p3, %p1000_p0 }
   0xa   :  { %1010 = shalt.err (!%p1007_p4)
}
   0xb   :  { %s1036_s18 = smov 64   ;;  %s1037_s19 = smov 4  }
   0xc   :  { %26 = dma.hbm_to_vmem [thread:$0]  %s1208_s2, 2304, %s21_s16, [#allocation3], %s1036_s18, %s1036_s18, %s1037_s19  }
   0xd   :  { %1031 = dma.done.wait [#allocation3], 2304  }
   0xe   :  { %1032 = vsyncadd [#allocation3], 4294964992  ;;  %v1038_v0 = vmov 0   ;;  %v35_v1 = vld [vmem:[%s1206_s0 + $0x10] sm:$0xff]  ;;  %v33_v2 = vld [vmem:[%s1206_s0] sm:$0xff]  ;;  %v37_v9 = vlaneseq  ;;  %vm93_vm4 = vcmask 523264  }
   0xf   :  { %960 = vset.pattern.permute.xlu1 %v1038_v0  ;;  %959 = vset.pattern.permute.xlu0 %v1038_v0  ;;  %v36_v3 = vld [vmem:[%s1206_s0 + $0x18] sm:$0xff]  ;;  %v34_v4 = vld [vmem:[%s1206_s0 + $0x8] sm:$0xff]  ;;  %v962_v6 = vld [vmem:[%s1207_s1 + $0x10] sm:$0xff]   ;;  %v1039_v15 = vmov 0.0   ;;  %vm159_vm5 = vcmask 1046528   ;;  %vm405_vm6 = vcmask 1044480  }
  0x10   :  { %46 = vperm.xlu1 %960, %v35_v1   ;;  %40 = vperm.xlu0 %959, %v33_v2   ;;  %v961_v5 = vld [vmem:[%s1207_s1 + $0x18] sm:$0xff]   ;;  %v963_v7 = vld [vmem:[%s1207_s1 + $0x8] sm:$0xff]   ;;  %v964_v8 = vld [vmem:[%s1207_s1] sm:$0xff]   ;;  %v1096_v10 = vand.u32 127, %v37_v9  ;;  %vm191_vm7 = vcmask 261120   ;;  %vm314_vm8 = vcmask 1045504  }
  0x11   :  { %879 = vmatprep.subr.bf16.mxu0 %v961_v5  ;;  %v965_v22 = vld [vmem:[#allocation2 + $0x8] sm:$0xff]   ;;  %v966_v23 = vld [vmem:[#allocation2 + $0x18] sm:$0xff]   ;;  %v967_v24 = vld [vmem:[#allocation2] sm:$0xff]   ;;  %vm496_vm9 = vcmask 1043456   ;;  %vm1040_vm10 = vmmov 0  }
  0x12   :  { %880 = vmatpush3.bf16.msra.mxu0 %v961_v5  ;;  %899 = vmatprep.subr.bf16.mxu1 %v965_v22  ;;  %v968_v25 = vld [vmem:[#allocation2 + $0x10] sm:$0xff]   ;;  %v969_v26 = vld [vmem:[#allocation2 + $0x38] sm:$0xff]   ;;  %v970_v27 = vld [vmem:[#allocation2 + $0x28] sm:$0xff]   ;;  %vm604_vm11 = vcmp.lt.s32.totalorder %v1096_v10, 16  ;;  %vm607_vm12 = vcmp.ge.s32.totalorder %v1096_v10, 16  ;;  %vm608_vm13 = vcmp.lt.s32.totalorder %v1096_v10, 32 }
  0x13   :  { %881 = vmatprep.subr.bf16.mxu0 %v962_v6  ;;  %900 = vmatpush3.bf16.msra.mxu1 %v965_v22  ;;  %v971_v56 = vld [vmem:[#allocation2 + $0x30] sm:$0xff]   ;;  %v972_v57 = vld [vmem:[#allocation2 + $0x20] sm:$0xff]   ;;  %v973_v1 = vld [vmem:[#allocation2 + $0x48] sm:$0xff]   ;;  %vm611_vm14 = vcmp.ge.s32.totalorder %v1096_v10, 32 }
  0x14   :  { %49 = vperm.xlu1 %960, %v36_v3   ;;  %43 = vperm.xlu0 %959, %v34_v4   ;;  %v980_v22 = vld [vmem:[#allocation2 + $0x60] sm:$0xff]   ;;  %vm1166_vm15 = vmand %vm607_vm12, %vm608_vm13 }
  0x15   :  { %901 = vmatprep.subr.bf16.mxu1 %v967_v24 }
  0x16   :  { %882 = vmatpush3.bf16.msra.mxu0 %v962_v6 }
  0x17   :  { %883 = vmatprep.subr.bf16.mxu0 %v963_v7  ;;  %902 = vmatpush3.bf16.msra.mxu1 %v967_v24  ;;  %v982_v24 = vld [vmem:[#allocation2 + $0x50] sm:$0xff]  }
  0x18   :  { %915 = vmatprep.subr.bf16.mxu1 %v969_v26 }
  0x1a   :  { %884 = vmatpush3.bf16.msra.mxu0 %v963_v7 }
  0x1b   :  { %885 = vmatprep.subr.bf16.mxu0 %v964_v8 }
  0x1e   :  { %886 = vmatpush3.bf16.msra.mxu0 %v964_v8  ;;  %v974_v8 = vld [vmem:[#allocation2 + $0x40] sm:$0xff]  }
  0x1f   :  { %891 = vmatprep.subr.bf16.mxu0 %v966_v23 }
  0x8b   :  { %v47_v11 = vpop.permute.xlu1 %46  ;;  %v41_v12 = vpop.permute.xlu0 %40 }
  0x8c   :  { %vm53_vm0 = vcmp.eq.s32.totalorder %v1096_v10, %v47_v11  ;;  %vm51_vm1 = vcmp.eq.s32.totalorder %v1096_v10, %v41_v12 }
  0x8d   :  { %v57_v16 = vsel %vm53_vm0, 1.0, %v1039_v15  ;;  %v55_v17 = vsel %vm51_vm1, 1.0, %v1039_v15  ;;  %vm612_vm0 = vcmp.lt.s32.totalorder %v1096_v10, 48 }
  0x8e   :  { %vm613_vm1 = vmand %vm611_vm14, %vm612_vm0 }
  0x8f   :  { %v50_v13 = vpop.permute.xlu1 %49  ;;  %v44_v14 = vpop.permute.xlu0 %43 }
  0x90   :  { %vm54_vm2 = vcmp.eq.s32.totalorder %v1096_v10, %v50_v13  ;;  %vm52_vm3 = vcmp.eq.s32.totalorder %v1096_v10, %v44_v14 }
  0x91   :  { %v58_v18 = vsel %vm54_vm2, 1.0, %v1039_v15  ;;  %v56_v19 = vsel %vm52_vm3, 1.0, %v1039_v15 }
  0x92   :  { %v60_v20 = vpack.c.bf16 %v58_v18, %v57_v16  ;;  %v59_v21 = vpack.c.bf16 %v56_v19, %v55_v17  ;;  %v975_v17 = vld [vmem:[#allocation2 + $0x88] sm:$0xff]   ;;  %v976_v18 = vld [vmem:[#allocation2 + $0x80] sm:$0xff]   ;;  %v977_v19 = vld [vmem:[#allocation2 + $0x78] sm:$0xff]  }
  0x94   :  { %887 = vmatprep.mubr.msk.bf16.mxu0 %vm93_vm4, %v59_v21  ;;  %v979_v21 = vld [vmem:[#allocation2 + $0x68] sm:$0xff]  }
  0x95   :  { %888 = vmatmul.mubr.msk.bf16.vlgmr.msra.gmra.mxu0 %vm93_vm4, %v60_v20  ;;  %v978_v20 = vld [vmem:[#allocation2 + $0x70] sm:$0xff]   ;;  %vm662_vm4 = vcmask 1041409  }
  0x96   :  { %892 = vmatpush3.bf16.msra.mxu0 %v966_v23  ;;  %v981_v23 = vld [vmem:[#allocation2 + $0x58] sm:$0xff]  }
  0x97   :  { %893 = vmatprep.subr.bf16.mxu0 %v968_v25 }
  0x9a   :  { %894 = vmatpush3.bf16.msra.mxu0 %v968_v25 }
  0x9b   :  { %907 = vmatprep.subr.bf16.mxu0 %v970_v27 }
 0x155   :  { %v1106_v28 = vpop.f32.mrf.mxu0 }
 0x156   :  { %v163_v31 = vrot.slane %v1106_v28, 1  ;;  %v318_v33 = vrot.slane %v1106_v28, 2  ;;  %v409_v34 = vrot.slane %v1106_v28, 3  ;;  %v500_v63 = vrot.slane %v1106_v28, 4 }
 0x157   :  { %v1108_v29 = vpop.f32.mrf.mxu0 }
 0x158   :  { %v160_v35 = vrot.slane %v1108_v29, 1  ;;  %v315_v36 = vrot.slane %v1108_v29, 2  ;;  %v406_v38 = vrot.slane %v1108_v29, 3  ;;  %v497_v0 = vrot.slane %v1108_v29, 4 }
 0x159   :  { %v1110_v30 = vpop.f32.mrf.mxu0 }
 0x15a   :  { %v165_v32 = vrot.slane %v1110_v30, 1  ;;  %v154_v43 = vpack.c.bf16 %v1110_v30, %v1106_v28  ;;  %v411_v50 = vrot.slane %v1110_v30, 3  ;;  %v320_v58 = vrot.slane %v1110_v30, 2 }
 0x15b   :  { %v137_v37 = vpop.f32.mrf.mxu0  ;;  %v502_v11 = vrot.slane %v1110_v30, 4 }
 0x15c   :  { %v161_v39 = vrot.slane %v137_v37, 1  ;;  %v316_v40 = vrot.slane %v137_v37, 2  ;;  %v407_v41 = vrot.slane %v137_v37, 3  ;;  %v153_v42 = vpack.c.bf16 %v137_v37, %v1108_v29 }
 0x15d   :  { %v166_v44 = vsel %vm159_vm5, %v163_v31, %v165_v32  ;;  %v172_v45 = vsel %vm159_vm5, %v165_v32, %v160_v35  ;;  %v498_v60 = vrot.slane %v137_v37, 4  ;;  %v412_v61 = vsel %vm405_vm6, %v409_v34, %v411_v50 }
 0x15e   :  { %v162_v46 = vsel %vm159_vm5, %v160_v35, %v161_v39  ;;  %v164_v47 = vsel %vm159_vm5, %v161_v39, %v163_v31  ;;  %v408_v48 = vsel %vm405_vm6, %v406_v38, %v407_v41  ;;  %v410_v49 = vsel %vm405_vm6, %v407_v41, %v409_v34  ;;  %903 = vmatprep.mubr.msk.bf16.mxu1 %vm191_vm7, %v153_v42 }
 0x15f   :  { %v177_v51 = vpack.c.bf16 %v164_v47, %v162_v46  ;;  %v423_v52 = vpack.c.bf16 %v410_v49, %v408_v48  ;;  %v317_v53 = vsel %vm314_vm8, %v315_v36, %v316_v40  ;;  %904 = vmatmul.mubr.msk.bf16.vlgmr.msra.gmra.mxu1 %vm191_vm7, %v154_v43  ;;  %v178_v54 = vpack.c.bf16 %v172_v45, %v166_v44 }
 0x160   :  { %v319_v55 = vsel %vm314_vm8, %v316_v40, %v318_v33  ;;  %916 = vmatpush3.bf16.msra.mxu1 %v969_v26  ;;  %v418_v62 = vsel %vm405_vm6, %v411_v50, %v406_v38  ;;  %v321_v2 = vsel %vm314_vm8, %v318_v33, %v320_v58  ;;  %v327_v3 = vsel %vm314_vm8, %v320_v58, %v315_v36 }
 0x161   :  { %895 = vmatprep.mubr.msk.bf16.mxu0 %vm191_vm7, %v177_v51  ;;  %v332_v59 = vpack.c.bf16 %v319_v55, %v317_v53  ;;  %919 = vmatprep.mubr.msk.bf16.mxu1 %vm191_vm7, %v423_v52  ;;  %v424_v4 = vpack.c.bf16 %v418_v62, %v412_v61  ;;  %v499_v5 = vsel %vm496_vm9, %v497_v0, %v498_v60  ;;  %v1041_v43 = vmov 4294967295   ;;  %v834_v51 = vld [vmem:[%s1209_s3] ss:$0 sm:$0xff] }
 0x162   :  { %896 = vmatmul.mubr.msk.bf16.vlgmr.msra.gmra.mxu0 %vm191_vm7, %v178_v54  ;;  %917 = vmatprep.subr.bf16.mxu1 %v971_v56  ;;  %v501_v6 = vsel %vm496_vm9, %v498_v60, %v500_v63  ;;  %v333_v7 = vpack.c.bf16 %v327_v3, %v321_v2  ;;  %v503_v13 = vsel %vm496_vm9, %v500_v63, %v502_v11  ;;  %v606_v44 = vsel %vm604_vm11, 13, %v1041_v43 }
 0x163   :  { %908 = vmatpush3.bf16.msra.mxu0 %v970_v27  ;;  %911 = vmatprep.mubr.msk.bf16.mxu0 %vm191_vm7, %v332_v59  ;;  %v514_v12 = vpack.c.bf16 %v501_v6, %v499_v5  ;;  %v509_v14 = vsel %vm496_vm9, %v502_v11, %v497_v0  ;;  %v601_v55 = vshrl.u32 %v37_v9, 7  ;;  %vm773_vm5 = vcmp.ge.s32.totalorder %v1096_v10, 4 }
 0x164   :  { %909 = vmatprep.subr.bf16.mxu0 %v972_v57  ;;  %918 = vmatpush3.bf16.msra.mxu1 %v971_v56  ;;  %v515_v16 = vpack.c.bf16 %v509_v14, %v503_v13  ;;  %v610_v56 = vsel %vm1166_vm15, 12, %v606_v44  ;;  %vm774_vm6 = vcmp.lt.s32.totalorder %v1096_v10, 7  ;;  %vm757_vm9 = vcmask 1041408  }
 0x165   :  { %931 = vmatprep.subr.bf16.mxu1 %v1039_v15  ;;  %v602_v63 = vadd.s32 8, %v601_v55  ;;  %v614_v0 = vsel %vm613_vm1, 11, %v610_v56  ;;  %vm1183_vm8 = vmand %vm773_vm5, %vm774_vm6 }
 0x166   :  { %vm615_vm2 = vcmp.le.s32.totalorder %v601_v55, %v614_v0 }
 0x167   :  { %910 = vmatpush3.bf16.msra.mxu0 %v972_v57  ;;  %920 = vmatmul.mubr.msk.bf16.vlgmr.msra.gmra.mxu1 %vm191_vm7, %v424_v4  ;;  %vm616_vm3 = vcmp.le.s32.totalorder %v602_v63, %v614_v0 }
 0x168   :  { %923 = vmatprep.subr.bf16.mxu0 %v973_v1  ;;  %932 = vmatpush3.bf16.msra.mxu1 %v975_v17 }
 0x169   :  { %933 = vmatprep.subr.bf16.mxu1 %v1039_v15  ;;  %947 = vmatprep.mubr.msk.bf16.mxu1 %vm1040_vm10, %v1039_v15 }
 0x16a   :  { %912 = vmatmul.mubr.msk.bf16.vlgmr.msra.gmra.mxu0 %vm191_vm7, %v333_v7 }
 0x16b   :  { %924 = vmatpush3.bf16.msra.mxu0 %v973_v1  ;;  %927 = vmatprep.mubr.msk.bf16.mxu0 %vm191_vm7, %v514_v12 }
 0x16c   :  { %925 = vmatprep.subr.bf16.mxu0 %v974_v8  ;;  %934 = vmatpush3.bf16.msra.mxu1 %v976_v18 }
 0x16d   :  { %935 = vmatprep.subr.bf16.mxu1 %v1039_v15 }
 0x16f   :  { %926 = vmatpush3.bf16.msra.mxu0 %v974_v8 }
 0x170   :  { %936 = vmatpush3.bf16.msra.mxu1 %v977_v19 }
 0x171   :  { %937 = vmatprep.subr.bf16.mxu1 %v1039_v15 }
 0x172   :  { %928 = vmatmul.mubr.msk.bf16.vlgmr.msra.gmra.mxu0 %vm191_vm7, %v515_v16  ;;  %vm754_vm7 = vcmp.lt.s32.totalorder %v1096_v10, 4 }
 0x174   :  { %938 = vmatpush3.bf16.msra.mxu1 %v978_v20 }
 0x175   :  { %939 = vmatprep.subr.bf16.mxu1 %v1039_v15 }
 0x178   :  { %940 = vmatpush3.bf16.msra.mxu1 %v979_v21 }
 0x179   :  { %941 = vmatprep.subr.bf16.mxu1 %v1039_v15 }
 0x17c   :  { %942 = vmatpush3.bf16.msra.mxu1 %v980_v22 }
 0x17d   :  { %943 = vmatprep.subr.bf16.mxu1 %v1039_v15 }
 0x180   :  { %944 = vmatpush3.bf16.msra.mxu1 %v981_v23 }
 0x181   :  { %945 = vmatprep.subr.bf16.mxu1 %v1039_v15 }
 0x184   :  { %946 = vmatpush3.bf16.msra.mxu1 %v982_v24 }
 0x21f   :  { %v905_v25 = vpop.f32.mrf.mxu1 }
 0x221   :  { %v299_v26 = vpop.f32.mrf.mxu1 }
 0x222   :  { %v897_v27 = vpop.f32.mrf.mxu0 }
 0x223   :  { %v906_v28 = vpop.f32.mrf.mxu1  ;;  %v308_v35 = vadd.f32 %v905_v25, %v897_v27 }
 0x224   :  { %v232_v29 = vpop.f32.mrf.mxu0 }
 0x225   :  { %v302_v30 = vpop.f32.mrf.mxu1  ;;  %v300_v37 = vadd.f32 %v299_v26, %v232_v29 }
 0x226   :  { %v898_v31 = vpop.f32.mrf.mxu0 }
 0x227   :  { %v921_v33 = vpop.f32.mrf.mxu1  ;;  %v311_v15 = vadd.f32 %v906_v28, %v898_v31 }
 0x228   :  { %v235_v32 = vpop.f32.mrf.mxu0 }
 0x229   :  { %v477_v39 = vpop.f32.mrf.mxu1  ;;  %v303_v45 = vadd.f32 %v302_v30, %v235_v32 }
 0x22a   :  { %v913_v34 = vpop.f32.mrf.mxu0 }
 0x22b   :  { %v403_v38 = vadd.f32 %v913_v34, %v308_v35  ;;  %v922_v49 = vpop.f32.mrf.mxu1 }
 0x22c   :  { %v386_v36 = vpop.f32.mrf.mxu0 }
 0x22d   :  { %v401_v41 = vadd.f32 %v386_v36, %v300_v37  ;;  %v494_v47 = vadd.f32 %v921_v33, %v403_v38  ;;  %v480_v61 = vpop.f32.mrf.mxu1  ;;  %v835_v38 = vld [vmem:[%s1209_s3 + $0x1] ss:$0 sm:$0xff]  ;;  %s1042_s3 = smov [#allocation5]  }
 0x22e   :  { %v914_v40 = vpop.f32.mrf.mxu0  ;;  %s799_s13 = sshll.u32 %s1042_s3, 4  ;;  %s800_s13 = int_to_ptr.vmem [resolvable:$true] %s799_s13 }
 0x22f   :  { %v404_v46 = vadd.f32 %v914_v40, %v311_v15  ;;  %v492_v54 = vadd.f32 %v477_v39, %v401_v41  ;;  %s1011_s14 = scalar_lea.vmem %s800_s13, 32  ;;  %p1016_p6 = scmp.lt.s32.totalorder %s800_s13, %s800_s13 }
 0x230   :  { %v389_v42 = vpop.f32.mrf.mxu0  ;;  %p1012_p5 = scmp.ne.s32.totalorder %s800_s13, %s1011_s14  ;;  %p1017_p7 = scmp.lt.s32.totalorder %s1011_s14, %s1011_s14 }
 0x231   :  { %v402_v52 = vadd.f32 %v389_v42, %v303_v45  ;;  %v495_v60 = vadd.f32 %v922_v49, %v404_v46 }
 0x232   :  { %v929_v50 = vpop.f32.mrf.mxu0  ;;  %p1018_p8 = por %p1017_p7, %p1016_p6 }
 0x233   :  { %v585_v53 = vadd.f32 %v929_v50, %v494_v47  ;;  %v493_v3 = vadd.f32 %v480_v61, %v402_v52 }
 0x234   :  { %v568_v57 = vpop.f32.mrf.mxu0  ;;  %p1019_p9 = pnand %p1018_p8, %p1012_p5 }
 0x235   :  { %v594_v58 = vadd.f32 %v834_v51, %v585_v53  ;;  %v583_v59 = vadd.f32 %v568_v57, %v492_v54 }
 0x236   :  { %v930_v62 = vpop.f32.mrf.mxu0 }
 0x237   :  { %v592_v1 = vadd.f32 %v834_v51, %v583_v59  ;;  %v586_v2 = vadd.f32 %v930_v62, %v495_v60  ;;  %v598_v5 = vmax.f32 %v594_v58, 0.0 }
 0x238   :  { %v571_v4 = vpop.f32.mrf.mxu0 }
 0x239   :  { %v595_v6 = vadd.f32 %v834_v51, %v586_v2  ;;  %v584_v7 = vadd.f32 %v571_v4, %v493_v3  ;;  %v596_v9 = vmax.f32 %v592_v1, 0.0  ;;  %v619_v12 = vsel %vm615_vm2, %v598_v5, 0.0 }
 0x23b   :  { %v599_v8 = vmax.f32 %v595_v6, 0.0  ;;  %v593_v11 = vadd.f32 %v834_v51, %v584_v7  ;;  %v617_v17 = vsel %vm615_vm2, %v596_v9, 0.0 }
 0x23d   :  { %v620_v13 = vsel %vm616_vm3, %v599_v8, 0.0  ;;  %v597_v14 = vmax.f32 %v593_v11, 0.0 }
 0x23e   :  { %v628_v16 = vmax.f32 %v619_v12, %v620_v13 }
 0x23f   :  { %v618_v18 = vsel %vm616_vm3, %v597_v14, 0.0 }
 0x240   :  { %v629_v19 = vrot.slane %v628_v16, 4  ;;  %v621_v20 = vmax.f32 %v617_v17, %v618_v18 }
 0x242   :  { %v630_v21 = vmax.f32 %v628_v16, %v629_v19  ;;  %v622_v22 = vrot.slane %v621_v20, 4 }
 0x244   :  { %v631_v23 = vrot.slane %v630_v21, 2  ;;  %v623_v24 = vmax.f32 %v621_v20, %v622_v22 }
 0x246   :  { %v632_v25 = vmax.f32 %v630_v21, %v631_v23  ;;  %v624_v26 = vrot.slane %v623_v24, 2 }
 0x248   :  { %v633_v27 = vrot.slane %v632_v25, 1  ;;  %v625_v28 = vmax.f32 %v623_v24, %v624_v26 }
 0x24a   :  { %v634_v29 = vmax.f32 %v632_v25, %v633_v27  ;;  %v626_v30 = vrot.slane %v625_v28, 1 }
 0x24c   :  { %v653_v31 = vpack.c.bf16 %v634_v29, %v634_v29  ;;  %v627_v32 = vmax.f32 %v625_v28, %v626_v30 }
 0x24e   :  { %v652_v33 = vpack.c.bf16 %v627_v32, %v627_v32  ;;  %v661_v35 = vunpack.c.l.b16 %v653_v31 }
 0x250   :  { %v660_v34 = vunpack.c.l.b16 %v652_v33 }
 0x252   :  { %v663_v36 = vsel %vm662_vm4, %v661_v35, %v660_v34 }
 0x253   :  { %v664_v37 = vpack.c.b16 %v663_v36, %v663_v36 }
 0x255   :  { %948 = vmatmul.mubr.bf16.vlgmr.msra.gmra.mxu1 %v664_v37 }
 0x315   :  { %v748_v39 = vpop.f32.mrf.mxu1 }
 0x316   :  { %v749_v15 = vadd.f32 %v835_v38, %v748_v39 }
 0x317   :  { %v949_v41 = vpop.f32.mrf.mxu1 }
 0x318   :  { %v756_v42 = vsel %vm754_vm7, %v749_v15, -1e+30  ;;  %v776_v43 = vsel %vm1183_vm8, %v749_v15, -1e+30 }
 0x319   :  { %v751_v44 = vpop.f32.mrf.mxu1  ;;  %v777_v45 = vsel %vm757_vm9, %v776_v43, -inf  ;;  %v758_v46 = vsel %vm757_vm9, %v756_v42, -inf }
 0x31a   :  { %778 = vmax.xlane.f32.xlu1 %v777_v45  ;;  %759 = vmax.xlane.f32.xlu0 %v758_v46 }
 0x31b   :  { %v950_v47 = vpop.f32.mrf.mxu1 }
 0x3a3   :  { %v779_v48 = vpop.xlane.xlu1 %778  ;;  %v760_v49 = vpop.xlane.xlu0 %759 }
 0x3a4   :  { %v780_v50 = vsub.f32 %v776_v43, %v779_v48  ;;  %v761_v51 = vsub.f32 %v756_v42, %v760_v49 }
 0x3a6   :  { %v781_v52 = vmul.f32 1.442695, %v780_v50  ;;  %v762_v53 = vmul.f32 1.442695, %v761_v51 }
 0x3a8   :  { %983 = vpow2.f32 %v781_v52 }
 0x3a9   :  { %985 = vpow2.f32 %v762_v53 }
 0x3b5   :  { %v984_v54 = vpop.eup %983 }
 0x3b6   :  { %v986_v55 = vpop.eup %985  ;;  %v783_v58 = vsel %vm1183_vm8, %v984_v54, 0.0 }
 0x3b7   :  { %v764_v56 = vsel %vm754_vm7, %v986_v55, 0.0  ;;  %v784_v59 = vsel %vm757_vm9, %v783_v58, 0.0 }
 0x3b8   :  { %v765_v57 = vsel %vm757_vm9, %v764_v56, 0.0 }
 0x3b9   :  { %766 = vadd.xlane.f32.xlu0 %v765_v57 }
 0x3bd   :  { %785 = vadd.xlane.f32.xlu0 %v784_v59 }
 0x442   :  { %v767_v60 = vpop.xlane.xlu0 %766 }
 0x443   :  { %987 = vlog2.f32 %v767_v60 }
 0x446   :  { %v786_v61 = vpop.xlane.xlu0 %785 }
 0x447   :  { %989 = vlog2.f32 %v786_v61 }
 0x450   :  { %v988_v62 = vpop.eup %987 }
 0x451   :  { %v769_v63 = vmul.f32 0.6931472, %v988_v62 }
 0x453   :  { %v770_v0 = vadd.f32 %v769_v63, %v760_v49 }
 0x454   :  { %v990_v1 = vpop.eup %989 }
 0x455   :  { %v788_v2 = vmul.f32 0.6931472, %v990_v1  ;;  %v771_v3 = vsub.f32 %v756_v42, %v770_v0 }
 0x457   :  { %v789_v4 = vadd.f32 %v788_v2, %v779_v48  ;;  %v772_v6 = vsel %vm754_vm7, %v771_v3, 0.0 }
 0x459   :  { %v790_v5 = vsub.f32 %v776_v43, %v789_v4 }
 0x45b   :  { %v791_v7 = vsel %vm1183_vm8, %v790_v5, %v772_v6 }
 0x45c   :  { %792 = vst [vmem:[#allocation5] sm:$0x3] %v791_v7 }
 0x45d   :  { %1022 = shalt.err (!%p1019_p9)
}
 0x45e   :  { %802 = dma.vmem_to_hbm [thread:$0]  %s800_s13, 32, %s1210_s4, [#allocation4]  }
 0x45f   :  { %1033 = dma.done.wait [#allocation4], 32  }
 0x460   :  { %1034 = vsyncadd [#allocation4], 4294967264 }
 0x461   :  { %806 = vsyncpa [#allocation3], 1 }
 0x462   :  { %807 = vsyncpa [#allocation4], 1 }

</bundles_post_ra>
